<compile_context>
chip_gen: v7x
topology: tpu7x:2x2x1
jax: 0.10.0
libtpu: 0.0.40
codegen_flags: <defaults>
</compile_context>

<pallas_src>
import jax
import jax.numpy as jnp
from jax.experimental import pallas as pl
from jax.experimental.pallas import tpu as pltpu

K_IN = 28 * 28   # 784 (contraction dim of fc1; no padding needed for the MXU)
H1 = 256
H2 = 128
N_OUT = 10
N_PAD = 16       # fc3 output padded 10 -> 16 cols (out block last dim = full dim)

_VMEM_LIMIT_BYTES = 48 * 1024 * 1024  # < 64 MiB (v7x) and < 128 MiB (v5e/v6e)


def mlp_kernel(x_ref, w1_ref, b1_ref, w2_ref, b2_ref, w3_ref, b3_ref, o_ref):
    # fc1 + ReLU: cast the streamed f32 x tile to bf16 in-kernel (VPU), MXU
    # matmul with f32 accumulation; bias add + ReLU stay in f32.
    x = x_ref[...].astype(jnp.bfloat16)
    h1 = jnp.dot(x, w1_ref[...], preferred_element_type=jnp.float32)
    h1 = jnp.maximum(h1 + b1_ref[...], 0.0)
    # fc2 + ReLU
    h2 = jnp.dot(h1.astype(jnp.bfloat16), w2_ref[...],
                 preferred_element_type=jnp.float32)
    h2 = jnp.maximum(h2 + b2_ref[...], 0.0)
    # fc3 (logits): 16-wide output tile (cols 10..15 are zero weights/bias)
    out = jnp.dot(h2.astype(jnp.bfloat16), w3_ref[...],
                  preferred_element_type=jnp.float32)
    o_ref[...] = (out + b3_ref[...]).astype(o_ref.dtype)


def _round_up(x, m):
    return (x + m - 1) // m * m


def _cdiv(a, b):
    return (a + b - 1) // b


def prepare_params(w1, b1, w2, b2, w3, b3):
    """One-time parameter prep (hoisted out of the per-call forward):
    bf16 weight casts, fc3 pad 10 -> 16 output columns, f32 biases.
    Weights are stored [in, out] (transpose of nn.Linear)."""
    w1p = w1.astype(jnp.bfloat16)
    w2p = w2.astype(jnp.bfloat16)
    w3p = jnp.pad(w3, ((0, 0), (0, N_PAD - N_OUT))).astype(jnp.bfloat16)
    b1f = b1.reshape(1, H1).astype(jnp.float32)
    b2f = b2.reshape(1, H2).astype(jnp.float32)
    b3f = jnp.pad(b3.reshape(1, N_OUT),
                  ((0, 0), (0, N_PAD - N_OUT))).astype(jnp.float32)
    return (w1p, b1f, w2p, b2f, w3p, b3f)


def neural_net_forward(x, prepared_params, *, tb=2048):
    """x: [B, 1, 28, 28] or [B, 784] (any float dtype); returns logits [B, 10] f32."""
    w1p, b1f, w2p, b2f, w3p, b3f = prepared_params
    B = x.shape[0]
    # reshape only — no cast, no pad (kernel reads x as-is and casts in-body)
    x2d = x.reshape(B, K_IN)

    # Adaptive batch tile: TB <= tb, multiple of 8, padding bounded to <= 7
    # rows per tile (avoids up to 2x wasted DMA/MXU work for awkward B).
    TB = max(8, _round_up(_cdiv(B, _cdiv(B, tb)), 8))
    Bp = _round_up(B, TB)
    if Bp != B:
        x2d = jnp.pad(x2d, ((0, Bp - B), (0, 0)))

    out = pl.pallas_call(
        mlp_kernel,
        out_shape=jax.ShapeDtypeStruct((Bp, N_PAD), jnp.float32),
        grid_spec=pltpu.PrefetchScalarGridSpec(
            num_scalar_prefetch=0,
            grid=(Bp // TB,),
            in_specs=[
                # activations: streamed per batch tile (auto double-buffered);
                # last dim 784 == full array dim, so the block is legal unpadded
                pl.BlockSpec((TB, K_IN), lambda i: (i, 0)),
                # weights / biases: constant index_map -> stay resident in VMEM
                pl.BlockSpec((K_IN, H1), lambda i: (0, 0)),
                pl.BlockSpec((1, H1), lambda i: (0, 0)),
                pl.BlockSpec((H1, H2), lambda i: (0, 0)),
                pl.BlockSpec((1, H2), lambda i: (0, 0)),
                pl.BlockSpec((H2, N_PAD), lambda i: (0, 0)),
                pl.BlockSpec((1, N_PAD), lambda i: (0, 0)),
            ],
            out_specs=pl.BlockSpec((TB, N_PAD), lambda i: (i, 0)),
        ),
        compiler_params=pltpu.CompilerParams(
            dimension_semantics=("parallel",),
            vmem_limit_bytes=_VMEM_LIMIT_BYTES,
        ),
    )(x2d, w1p, b1f, w2p, b2f, w3p, b3f)

    return out[:B, :N_OUT]


def init_params(key):
    """Deterministic init mimicking PyTorch nn.Linear (uniform +-1/sqrt(fan_in)).
    Weights are stored as [in, out] (transposed vs PyTorch)."""
    dims = [(K_IN, H1), (H1, H2), (H2, N_OUT)]
    params = []
    for (fan_in, fan_out) in dims:
        key, kw, kb = jax.random.split(key, 3)
        bound = 1.0 / (fan_in ** 0.5)
        w = jax.random.uniform(kw, (fan_in, fan_out), jnp.float32, -bound, bound)
        b = jax.random.uniform(kb, (1, fan_out), jnp.float32, -bound, bound)
        params += [w, b]
    return params


def reference_forward(x, w1, b1, w2, b2, w3, b3):
    """Plain-JAX reference mirroring the kernel's bf16 rounding of operands
    (products are exact in f32, so this matches the MXU path tightly)."""
    B = x.shape[0]
    xf = x.reshape(B, K_IN).astype(jnp.bfloat16).astype(jnp.float32)
    w1f = w1.astype(jnp.bfloat16).astype(jnp.float32)
    w2f = w2.astype(jnp.bfloat16).astype(jnp.float32)
    w3f = w3.astype(jnp.bfloat16).astype(jnp.float32)
    h1 = jnp.maximum(xf @ w1f + b1, 0.0)
    h1 = h1.astype(jnp.bfloat16).astype(jnp.float32)
    h2 = jnp.maximum(h1 @ w2f + b2, 0.0)
    h2 = h2.astype(jnp.bfloat16).astype(jnp.float32)
    return h2 @ w3f + b3


if __name__ == "__main__":
    key = jax.random.PRNGKey(0)
    key, kx = jax.random.split(key)
    # Small batch of MNIST-shaped inputs (NCHW), consistent with the forward.
    x = jax.random.normal(kx, (8, 1, 28, 28), jnp.float32)

    w1, b1, w2, b2, w3, b3 = init_params(key)
    prepared = prepare_params(w1, b1, w2, b2, w3, b3)

    out = neural_net_forward(x, prepared)
    out = jax.block_until_ready(out)

    assert out.shape == (8, 10)
    ref = reference_forward(x, w1, b1, w2, b2, w3, b3)
    assert jnp.allclose(out, ref, atol=1e-3, rtol=1e-3), float(
        jnp.max(jnp.abs(out - ref)))

    print("KERNEL_OK")
</pallas_src>

<mosaic_0001>
module attributes {stable_mosaic.version = 11 : i64} {
  func.func @mlp_kernel(%arg0: i32, %arg1: memref<8x784xf32, #tpu.memory_space<vmem>>, %arg2: memref<784x256xbf16, #tpu.memory_space<vmem>>, %arg3: memref<1x256xf32, #tpu.memory_space<vmem>>, %arg4: memref<256x128xbf16, #tpu.memory_space<vmem>>, %arg5: memref<1x128xf32, #tpu.memory_space<vmem>>, %arg6: memref<128x16xbf16, #tpu.memory_space<vmem>>, %arg7: memref<1x16xf32, #tpu.memory_space<vmem>>, %arg8: memref<8x16xf32, #tpu.memory_space<vmem>>) attributes {dimension_semantics = [#tpu.dimension_semantics<parallel>], iteration_bounds = array<i64: 1>, scalar_prefetch = 0 : i64, scratch_operands = 0 : i64, tpu.core_type = #tpu.core_type<tc>, window_params = [{transform_indices = @transform_0, window_bounds = array<i64: 8, 784>}, {pipeline_mode = #tpu.pipeline_mode<synchronous>, transform_indices = @transform_1, window_bounds = array<i64: 784, 256>}, {pipeline_mode = #tpu.pipeline_mode<synchronous>, transform_indices = @transform_2, window_bounds = array<i64: 1, 256>}, {pipeline_mode = #tpu.pipeline_mode<synchronous>, transform_indices = @transform_3, window_bounds = array<i64: 256, 128>}, {pipeline_mode = #tpu.pipeline_mode<synchronous>, transform_indices = @transform_4, window_bounds = array<i64: 1, 128>}, {pipeline_mode = #tpu.pipeline_mode<synchronous>, transform_indices = @transform_5, window_bounds = array<i64: 128, 16>}, {pipeline_mode = #tpu.pipeline_mode<synchronous>, transform_indices = @transform_6, window_bounds = array<i64: 1, 16>}, {transform_indices = @transform_7, window_bounds = array<i64: 8, 16>}]} {
    %c0 = arith.constant 0 : index
    %c0_0 = arith.constant 0 : index
    %0 = vector.load %arg1[%c0, %c0_0] : memref<8x784xf32, #tpu.memory_space<vmem>>, vector<8x784xf32>
    %1 = arith.truncf %0 : vector<8x784xf32> to vector<8x784xbf16>
    %c0_1 = arith.constant 0 : index
    %c0_2 = arith.constant 0 : index
    %2 = vector.load %arg2[%c0_1, %c0_2] : memref<784x256xbf16, #tpu.memory_space<vmem>>, vector<784x256xbf16>
    %cst = arith.constant dense<0.000000e+00> : vector<8x256xf32>
    %3 = tpu.matmul %1, %2, %cst {dimension_numbers = #tpu.dot_dimension_numbers<[1], [0], [0], [1], [0, 0, 1, 1], [], []>} : vector<8x784xbf16>, vector<784x256xbf16>, vector<8x256xf32> -> vector<8x256xf32>
    %c0_3 = arith.constant 0 : index
    %c0_4 = arith.constant 0 : index
    %4 = vector.load %arg3[%c0_3, %c0_4] : memref<1x256xf32, #tpu.memory_space<vmem>>, vector<1x256xf32>
    %5 = vector.broadcast %4 : vector<1x256xf32> to vector<8x256xf32>
    %6 = arith.addf %3, %5 : vector<8x256xf32>
    %cst_5 = arith.constant 0.000000e+00 : f32
    %7 = vector.broadcast %cst_5 : f32 to vector<8x256xf32>
    %8 = arith.maximumf %6, %7 : vector<8x256xf32>
    %9 = arith.truncf %8 : vector<8x256xf32> to vector<8x256xbf16>
    %c0_6 = arith.constant 0 : index
    %c0_7 = arith.constant 0 : index
    %10 = vector.load %arg4[%c0_6, %c0_7] : memref<256x128xbf16, #tpu.memory_space<vmem>>, vector<256x128xbf16>
    %cst_8 = arith.constant dense<0.000000e+00> : vector<8x128xf32>
    %11 = tpu.matmul %9, %10, %cst_8 {dimension_numbers = #tpu.dot_dimension_numbers<[1], [0], [0], [1], [0, 0, 1, 1], [], []>} : vector<8x256xbf16>, vector<256x128xbf16>, vector<8x128xf32> -> vector<8x128xf32>
    %c0_9 = arith.constant 0 : index
    %c0_10 = arith.constant 0 : index
    %12 = vector.load %arg5[%c0_9, %c0_10] : memref<1x128xf32, #tpu.memory_space<vmem>>, vector<1x128xf32>
    %13 = vector.broadcast %12 : vector<1x128xf32> to vector<8x128xf32>
    %14 = arith.addf %11, %13 : vector<8x128xf32>
    %cst_11 = arith.constant 0.000000e+00 : f32
    %15 = vector.broadcast %cst_11 : f32 to vector<8x128xf32>
    %16 = arith.maximumf %14, %15 : vector<8x128xf32>
    %17 = arith.truncf %16 : vector<8x128xf32> to vector<8x128xbf16>
    %c0_12 = arith.constant 0 : index
    %c0_13 = arith.constant 0 : index
    %18 = vector.load %arg6[%c0_12, %c0_13] : memref<128x16xbf16, #tpu.memory_space<vmem>>, vector<128x16xbf16>
    %cst_14 = arith.constant dense<0.000000e+00> : vector<8x16xf32>
    %19 = tpu.matmul %17, %18, %cst_14 {dimension_numbers = #tpu.dot_dimension_numbers<[1], [0], [0], [1], [0, 0, 1, 1], [], []>} : vector<8x128xbf16>, vector<128x16xbf16>, vector<8x16xf32> -> vector<8x16xf32>
    %c0_15 = arith.constant 0 : index
    %c0_16 = arith.constant 0 : index
    %20 = vector.load %arg7[%c0_15, %c0_16] : memref<1x16xf32, #tpu.memory_space<vmem>>, vector<1x16xf32>
    %21 = vector.broadcast %20 : vector<1x16xf32> to vector<8x16xf32>
    %22 = arith.addf %19, %21 : vector<8x16xf32>
    %c0_17 = arith.constant 0 : index
    %c0_18 = arith.constant 0 : index
    %23 = vector.load %arg8[%c0_17, %c0_18] : memref<8x16xf32, #tpu.memory_space<vmem>>, vector<8x16xf32>
    tpu.vector_store %arg8[%c0_17, %c0_18], %22 {strides = array<i32>} : memref<8x16xf32, #tpu.memory_space<vmem>>, vector<8x16xf32>,
    return
  }
  func.func @transform_0(%arg0: i32) -> (i32, i32) {
    %c0_i32 = arith.constant 0 : i32
    %c0_i32_0 = arith.constant 0 : i32
    return %arg0, %c0_i32 : i32, i32
  }
  func.func @transform_1(%arg0: i32) -> (i32, i32) {
    %c0_i32 = arith.constant 0 : i32
    %c0_i32_0 = arith.constant 0 : i32
    %c0_i32_1 = arith.constant 0 : i32
    return %c0_i32, %c0_i32_0 : i32, i32
  }
  func.func @transform_2(%arg0: i32) -> (i32, i32) {
    %c0_i32 = arith.constant 0 : i32
    %c0_i32_0 = arith.constant 0 : i32
    %c0_i32_1 = arith.constant 0 : i32
    return %c0_i32, %c0_i32_0 : i32, i32
  }
  func.func @transform_3(%arg0: i32) -> (i32, i32) {
    %c0_i32 = arith.constant 0 : i32
    %c0_i32_0 = arith.constant 0 : i32
    %c0_i32_1 = arith.constant 0 : i32
    return %c0_i32, %c0_i32_0 : i32, i32
  }
  func.func @transform_4(%arg0: i32) -> (i32, i32) {
    %c0_i32 = arith.constant 0 : i32
    %c0_i32_0 = arith.constant 0 : i32
    %c0_i32_1 = arith.constant 0 : i32
    return %c0_i32, %c0_i32_0 : i32, i32
  }
  func.func @transform_5(%arg0: i32) -> (i32, i32) {
    %c0_i32 = arith.constant 0 : i32
    %c0_i32_0 = arith.constant 0 : i32
    %c0_i32_1 = arith.constant 0 : i32
    return %c0_i32, %c0_i32_0 : i32, i32
  }
  func.func @transform_6(%arg0: i32) -> (i32, i32) {
    %c0_i32 = arith.constant 0 : i32
    %c0_i32_0 = arith.constant 0 : i32
    %c0_i32_1 = arith.constant 0 : i32
    return %c0_i32, %c0_i32_0 : i32, i32
  }
  func.func @transform_7(%arg0: i32) -> (i32, i32) {
    %c0_i32 = arith.constant 0 : i32
    %c0_i32_0 = arith.constant 0 : i32
    return %arg0, %c0_i32 : i32, i32
  }
}

</mosaic_0001>

<bundles_post_ra>
// kernel: tpu_custom_call.1
= control target key start
LH: loop header
LB: loop body
LE: loop exit
PB: predicated region body
PF: predicated region fallthrough
CT: control target
= control target key end

     0   :  { %12 = vsyncpa [#allocation3], 0  ;;  %s1730_s0 = inlined_call_operand.vmem [shape: f32[8,784], index: 0, kind: input, shape index: {}]   ;;  %s1731_s1 = inlined_call_operand.hbm [shape: bf16[784,256], index: 1, kind: input, shape index: {}]   ;;  %s1732_s2 = inlined_call_operand.vmem [shape: f32[1,256], index: 2, kind: input, shape index: {}]   ;;  %s1733_s3 = inlined_call_operand.hbm [shape: bf16[256,128], index: 3, kind: input, shape index: {}]   ;;  %s1734_s4 = inlined_call_operand.vmem [shape: f32[1,128], index: 4, kind: input, shape index: {}]   ;;  %s1735_s5 = inlined_call_operand.vmem [shape: bf16[128,16], index: 5, kind: input, shape index: {}]   ;;  %s1736_s6 = inlined_call_operand.vmem [shape: f32[1,16], index: 6, kind: input, shape index: {}]   ;;  %s1737_s7 = inlined_call_operand.hbm [shape: f32[8,16], index: 7, kind: output, shape index: {}]  }
   0x1   :  { %13 = vsyncpa [#allocation6], 0 }
   0x2   :  { %14 = vsyncpa [#allocation4], 0  ;;  %s1588_s24 = smov [#allocation2]   ;;  %s1516_s28 = scalar_lea.hbm %s1731_s1, 12544 }
   0x3   :  { %s22_s25 = sshll.u32 %s1588_s24, 4  ;;  %p1517_p0 = scmp.ne.s32.totalorder %s1731_s1, %s1516_s28  ;;  %s23_s25 = int_to_ptr.vmem [resolvable:$true] %s22_s25 }
   0x4   :  { %p1520_p1 = scmp.lt.u32.totalorder %s1516_s28, %s1731_s1 }
   0x6   :  { %p1522_p2 = pnand %p1520_p1, %p1517_p0 }
   0x8   :  { %1525 = shalt.err (!%p1522_p2)
}
   0x9   :  { %s1526_s10 = scalar_lea.vmem %s23_s25, 12544  ;;  %p1531_p4 = scmp.lt.s32.totalorder %s23_s25, %s23_s25 }
   0xa   :  { %p1527_p3 = scmp.ne.s32.totalorder %s23_s25, %s1526_s10  ;;  %p1532_p5 = scmp.lt.s32.totalorder %s1526_s10, %s1526_s10 }
   0xc   :  { %p1533_p6 = por %p1532_p5, %p1531_p4 }
   0xe   :  { %p1534_p7 = pnand %p1533_p6, %p1527_p3 }
  0x10   :  { %1537 = shalt.err (!%p1534_p7)
}
  0x11   :  { %s1589_s11 = smov 128   ;;  %s1590_s12 = smov 8  }
  0x12   :  { %28 = dma.hbm_to_vmem [thread:$0]  %s1731_s1, 12544, %s23_s25, [#allocation3], %s1589_s11, %s1589_s11, %s1590_s12  }
  0x13   :  { %s1591_s15 = smov [#allocation5]   ;;  %s1538_s19 = scalar_lea.hbm %s1733_s3, 2048 }
  0x14   :  { %s36_s16 = sshll.u32 %s1591_s15, 4  ;;  %p1539_p8 = scmp.ne.s32.totalorder %s1733_s3, %s1538_s19  ;;  %s37_s16 = int_to_ptr.vmem [resolvable:$true] %s36_s16 }
  0x15   :  { %p1542_p9 = scmp.lt.u32.totalorder %s1538_s19, %s1733_s3 }
  0x17   :  { %p1544_p10 = pnand %p1542_p9, %p1539_p8 }
  0x19   :  { %1547 = shalt.err (!%p1544_p10)
}
  0x1a   :  { %s1548_s24 = scalar_lea.vmem %s37_s16, 2048  ;;  %p1553_p12 = scmp.lt.s32.totalorder %s37_s16, %s37_s16 }
  0x1b   :  { %p1549_p11 = scmp.ne.s32.totalorder %s37_s16, %s1548_s24  ;;  %p1554_p13 = scmp.lt.s32.totalorder %s1548_s24, %s1548_s24 }
  0x1d   :  { %p1555_p0 = por %p1554_p13, %p1553_p12 }
  0x1f   :  { %p1556_p1 = pnand %p1555_p0, %p1549_p11 }
  0x21   :  { %1559 = shalt.err (!%p1556_p1)
}
  0x22   :  { %s1592_s1 = smov 64   ;;  %s1593_s25 = smov 4  }
  0x23   :  { %42 = dma.hbm_to_vmem [thread:$0]  %s1733_s3, 2048, %s37_s16, [#allocation6], %s1592_s1, %s1592_s1, %s1593_s25  }
  0x24   :  { %1582 = dma.done.wait [#allocation3], 12544  }
  0x25   :  { %1583 = vsyncadd [#allocation3], 4294954752 }
  0x26   :  { %1584 = dma.done.wait [#allocation6], 2048  }
  0x27   :  { %1585 = vsyncadd [#allocation6], 4294965248  ;;  %v1345_v0 = vld [vmem:[#allocation2 + $0x104] ss:$8 sps:$4 sm:$0xff]   ;;  %v1347_v1 = vld [vmem:[#allocation2 + $0x100] ss:$8 sps:$4 sm:$0xff]  }
  0x28   :  { %715 = vmatprep.subr.bf16.mxu0 %v1345_v0  ;;  %v1348_v2 = vld [vmem:[#allocation2 + $0x114] ss:$8 sps:$4 sm:$0xff]   ;;  %v1350_v3 = vld [vmem:[#allocation2 + $0x110] ss:$8 sps:$4 sm:$0xff]   ;;  %v1351_v4 = vld [vmem:[#allocation2 + $0x124] ss:$8 sps:$4 sm:$0xff]  }
  0x29   :  { %716 = vmatpush1.bf16.msra.mxu0 %v1347_v1  ;;  %v1353_v5 = vld [vmem:[#allocation2 + $0x120] ss:$8 sps:$4 sm:$0xff]   ;;  %v1354_v6 = vld [vmem:[#allocation2 + $0x134] ss:$8 sps:$4 sm:$0xff]   ;;  %v1356_v7 = vld [vmem:[#allocation2 + $0x130] ss:$8 sps:$4 sm:$0xff]  }
  0x2a   :  { %717 = vmatprep.subr.bf16.mxu0 %v1348_v2  ;;  %v1357_v8 = vld [vmem:[#allocation2 + $0x144] ss:$8 sps:$4 sm:$0xff]   ;;  %v1359_v9 = vld [vmem:[#allocation2 + $0x140] ss:$8 sps:$4 sm:$0xff]   ;;  %v1360_v10 = vld [vmem:[#allocation2 + $0x154] ss:$8 sps:$4 sm:$0xff]  }
  0x2b   :  { %v1362_v11 = vld [vmem:[#allocation2 + $0x150] ss:$8 sps:$4 sm:$0xff]   ;;  %v1363_v12 = vld [vmem:[#allocation2 + $0x164] ss:$8 sps:$4 sm:$0xff]   ;;  %v1365_v15 = vld [vmem:[#allocation2 + $0x160] ss:$8 sps:$4 sm:$0xff]  }
  0x2c   :  { %v59_v13 = vld [vmem:[%s1730_s0 + $0x18] sm:$0xff]  ;;  %v1399_v17 = vld [vmem:[#allocation2 + $0x4] ss:$8 sps:$4 sm:$0xff]   ;;  %v1404_v20 = vld [vmem:[#allocation2] ss:$8 sps:$4 sm:$0xff]   ;;  %vm670_vm0 = vcmask 130048  }
  0x2d   :  { %718 = vmatpush1.bf16.msra.mxu0 %v1350_v3  ;;  %v66_v14 = vpack.c.bf16 %v59_v13, %v59_v13  ;;  %v1366_v16 = vld [vmem:[#allocation2 + $0x174] ss:$8 sps:$4 sm:$0xff]   ;;  %v1368_v18 = vld [vmem:[#allocation2 + $0x170] ss:$8 sps:$4 sm:$0xff]   ;;  %v1369_v19 = vld [vmem:[#allocation2 + $0x184] ss:$8 sps:$4 sm:$0xff]   ;;  %674 = vmatprep.subr.bf16.mxu1 %v1399_v17 }
  0x2e   :  { %719 = vmatprep.subr.bf16.mxu0 %v1351_v4  ;;  %v1405_v21 = vld [vmem:[#allocation2 + $0x14] ss:$8 sps:$4 sm:$0xff]   ;;  %675 = vmatpush1.bf16.msra.mxu1 %v1404_v20  ;;  %v1410_v22 = vld [vmem:[#allocation2 + $0x10] ss:$8 sps:$4 sm:$0xff]   ;;  %v1411_v23 = vld [vmem:[#allocation2 + $0x24] ss:$8 sps:$4 sm:$0xff]  }
  0x2f   :  { %747 = vmatprep.mubr.bf16.mxu0 %v66_v14  ;;  %676 = vmatprep.subr.bf16.mxu1 %v1405_v21  ;;  %v1371_v24 = vld [vmem:[#allocation2 + $0x180] ss:$8 sps:$4 sm:$0xff]   ;;  %v1372_v25 = vld [vmem:[#allocation2 + $0x194] ss:$8 sps:$4 sm:$0xff]   ;;  %v1374_v28 = vld [vmem:[#allocation2 + $0x190] ss:$8 sps:$4 sm:$0xff]  }
  0x30   :  { %v1416_v26 = vld [vmem:[#allocation2 + $0x20] ss:$8 sps:$4 sm:$0xff]   ;;  %v1417_v27 = vld [vmem:[#allocation2 + $0x34] ss:$8 sps:$4 sm:$0xff]   ;;  %v1375_v29 = vld [vmem:[#allocation2 + $0x1a4] ss:$8 sps:$4 sm:$0xff]  }
  0x31   :  { %720 = vmatpush1.bf16.msra.mxu0 %v1353_v5  ;;  %v1422_v30 = vld [vmem:[#allocation2 + $0x30] ss:$8 sps:$4 sm:$0xff]   ;;  %v1423_v31 = vld [vmem:[#allocation2 + $0x44] ss:$8 sps:$4 sm:$0xff]   ;;  %v1377_v32 = vld [vmem:[#allocation2 + $0x1a0] ss:$8 sps:$4 sm:$0xff]  }
  0x32   :  { %721 = vmatprep.subr.bf16.mxu0 %v1354_v6  ;;  %677 = vmatpush1.bf16.msra.mxu1 %v1410_v22  ;;  %v1378_v33 = vld [vmem:[#allocation2 + $0x1b4] ss:$8 sps:$4 sm:$0xff]   ;;  %v1428_v34 = vld [vmem:[#allocation2 + $0x40] ss:$8 sps:$4 sm:$0xff]   ;;  %v1380_v36 = vld [vmem:[#allocation2 + $0x1b0] ss:$8 sps:$4 sm:$0xff]  }
  0x33   :  { %678 = vmatprep.subr.bf16.mxu1 %v1411_v23  ;;  %v1429_v35 = vld [vmem:[#allocation2 + $0x54] ss:$8 sps:$4 sm:$0xff]   ;;  %v1381_v37 = vld [vmem:[#allocation2 + $0x1c4] ss:$8 sps:$4 sm:$0xff]   ;;  %v1434_v38 = vld [vmem:[#allocation2 + $0x50] ss:$8 sps:$4 sm:$0xff]  }
  0x34   :  { %v1435_v39 = vld [vmem:[#allocation2 + $0x64] ss:$8 sps:$4 sm:$0xff]   ;;  %v1383_v40 = vld [vmem:[#allocation2 + $0x1c0] ss:$8 sps:$4 sm:$0xff]   ;;  %v1384_v41 = vld [vmem:[#allocation2 + $0x1d4] ss:$8 sps:$4 sm:$0xff]  }
  0x35   :  { %722 = vmatpush1.bf16.msra.mxu0 %v1356_v7  ;;  %v1440_v42 = vld [vmem:[#allocation2 + $0x60] ss:$8 sps:$4 sm:$0xff]   ;;  %v1441_v43 = vld [vmem:[#allocation2 + $0x74] ss:$8 sps:$4 sm:$0xff]   ;;  %v1386_v44 = vld [vmem:[#allocation2 + $0x1d0] ss:$8 sps:$4 sm:$0xff]  }
  0x36   :  { %723 = vmatprep.subr.bf16.mxu0 %v1357_v8  ;;  %679 = vmatpush1.bf16.msra.mxu1 %v1416_v26  ;;  %v1387_v45 = vld [vmem:[#allocation2 + $0x1e4] ss:$8 sps:$4 sm:$0xff]   ;;  %v1446_v46 = vld [vmem:[#allocation2 + $0x70] ss:$8 sps:$4 sm:$0xff]   ;;  %v1389_v48 = vld [vmem:[#allocation2 + $0x1e0] ss:$8 sps:$4 sm:$0xff]  }
  0x37   :  { %680 = vmatprep.subr.bf16.mxu1 %v1417_v27  ;;  %v1447_v47 = vld [vmem:[#allocation2 + $0x84] ss:$8 sps:$4 sm:$0xff]   ;;  %v1390_v49 = vld [vmem:[#allocation2 + $0x1f4] ss:$8 sps:$4 sm:$0xff]   ;;  %v1452_v50 = vld [vmem:[#allocation2 + $0x80] ss:$8 sps:$4 sm:$0xff]  }
  0x38   :  { %v1392_v51 = vld [vmem:[#allocation2 + $0x1f0] ss:$8 sps:$4 sm:$0xff]   ;;  %v1453_v52 = vld [vmem:[#allocation2 + $0x94] ss:$8 sps:$4 sm:$0xff]   ;;  %v1395_v54 = vld [vmem:[#allocation2 + $0x204] ss:$8 sps:$4 sm:$0xff]  }
  0x39   :  { %724 = vmatpush1.bf16.msra.mxu0 %v1359_v9  ;;  %v58_v53 = vld [vmem:[%s1730_s0 + $0x10] sm:$0xff]  ;;  %v1459_v56 = vld [vmem:[#allocation2 + $0xa4] ss:$8 sps:$4 sm:$0xff]   ;;  %v1393_v59 = vld [vmem:[#allocation2 + $0x200] ss:$8 sps:$4 sm:$0xff]   ;;  %vm1596_vm1 = vmmov 0  }
  0x3a   :  { %725 = vmatprep.subr.bf16.mxu0 %v1360_v10  ;;  %681 = vmatpush1.bf16.msra.mxu1 %v1422_v30  ;;  %v1458_v55 = vld [vmem:[#allocation2 + $0x90] ss:$8 sps:$4 sm:$0xff]   ;;  %v65_v57 = vpack.c.bf16 %v58_v53, %v58_v53  ;;  %v61_v58 = vld [vmem:[%s1730_s0 + $0x28] sm:$0xff]  ;;  %v1398_v61 = vld [vmem:[#allocation2 + $0x214] ss:$8 sps:$4 sm:$0xff]  }
  0x3b   :  { %682 = vmatprep.subr.bf16.mxu1 %v1423_v31  ;;  %v68_v60 = vpack.c.bf16 %v61_v58, %v61_v58  ;;  %v1464_v62 = vld [vmem:[#allocation2 + $0xa0] ss:$8 sps:$4 sm:$0xff]   ;;  %v1465_v63 = vld [vmem:[#allocation2 + $0xb4] ss:$8 sps:$4 sm:$0xff]   ;;  %v1396_v1 = vld [vmem:[#allocation2 + $0x210] ss:$8 sps:$4 sm:$0xff]  }
  0x3c   :  { %v57_v0 = vld [vmem:[%s1730_s0 + $0x8] sm:$0xff]  ;;  %v1470_v4 = vld [vmem:[#allocation2 + $0xb0] ss:$8 sps:$4 sm:$0xff]   ;;  %v1409_v7 = vld [vmem:[#allocation2 + $0x234] ss:$8 sps:$4 sm:$0xff]  }
  0x3d   :  { %726 = vmatpush1.bf16.msra.mxu0 %v1362_v11  ;;  %v64_v2 = vpack.c.bf16 %v57_v0, %v57_v0  ;;  %v1403_v3 = vld [vmem:[#allocation2 + $0x224] ss:$8 sps:$4 sm:$0xff]   ;;  %v1401_v6 = vld [vmem:[#allocation2 + $0x220] ss:$8 sps:$4 sm:$0xff]   ;;  %v1477_v9 = vld [vmem:[#allocation2 + $0xd4] ss:$8 sps:$4 sm:$0xff]  }
  0x3e   :  { %727 = vmatprep.subr.bf16.mxu0 %v1363_v12  ;;  %683 = vmatpush1.bf16.msra.mxu1 %v1428_v34  ;;  %v1471_v5 = vld [vmem:[#allocation2 + $0xc4] ss:$8 sps:$4 sm:$0xff]   ;;  %v1476_v8 = vld [vmem:[#allocation2 + $0xc0] ss:$8 sps:$4 sm:$0xff]   ;;  %v1407_v10 = vld [vmem:[#allocation2 + $0x230] ss:$8 sps:$4 sm:$0xff]  }
  0x3f   :  { %684 = vmatprep.subr.bf16.mxu1 %v1429_v35  ;;  %706 = vmatprep.mubr.bf16.mxu1 %v64_v2  ;;  %v1415_v11 = vld [vmem:[#allocation2 + $0x244] ss:$8 sps:$4 sm:$0xff]   ;;  %v1413_v12 = vld [vmem:[#allocation2 + $0x240] ss:$8 sps:$4 sm:$0xff]   ;;  %v1482_v13 = vld [vmem:[#allocation2 + $0xd0] ss:$8 sps:$4 sm:$0xff]  }
  0x40   :  { %v1483_v14 = vld [vmem:[#allocation2 + $0xe4] ss:$8 sps:$4 sm:$0xff]   ;;  %v1489_v17 = vld [vmem:[#allocation2 + $0xf4] ss:$8 sps:$4 sm:$0xff]   ;;  %v1491_v20 = vld [vmem:[#allocation2 + $0xf0] ss:$8 sps:$4 sm:$0xff]  }
  0x41   :  { %728 = vmatpush1.bf16.msra.mxu0 %v1365_v15  ;;  %v1421_v15 = vld [vmem:[#allocation2 + $0x254] ss:$8 sps:$4 sm:$0xff]   ;;  %v56_v21 = vld [vmem:[%s1730_s0] sm:$0xff]  ;;  %v1498_v35 = vld [vmem:[#allocation5 + $0x58] sm:$0xff]  }
  0x42   :  { %729 = vmatprep.subr.bf16.mxu0 %v1366_v16  ;;  %685 = vmatpush1.bf16.msra.mxu1 %v1434_v38  ;;  %v1488_v16 = vld [vmem:[#allocation2 + $0xe0] ss:$8 sps:$4 sm:$0xff]   ;;  %v1492_v22 = vld [vmem:[#allocation5 + $0x40] sm:$0xff]   ;;  %v1494_v27 = vld [vmem:[#allocation5 + $0x48] sm:$0xff]  }
  0x43   :  { %686 = vmatprep.subr.bf16.mxu1 %v1435_v39  ;;  %v1425_v23 = vld [vmem:[#allocation2 + $0x260] ss:$8 sps:$4 sm:$0xff]   ;;  %v1493_v26 = vld [vmem:[#allocation5] sm:$0xff]   ;;  %v1495_v30 = vld [vmem:[#allocation5 + $0x8] sm:$0xff]  }
  0x44   :  { %v1496_v31 = vld [vmem:[#allocation5 + $0x50] sm:$0xff]   ;;  %v1499_v38 = vld [vmem:[#allocation5 + $0x18] sm:$0xff]   ;;  %v1500_v39 = vld [vmem:[#allocation5 + $0x60] sm:$0xff]  }
  0x45   :  { %730 = vmatpush1.bf16.msra.mxu0 %v1368_v18  ;;  %v1419_v18 = vld [vmem:[#allocation2 + $0x250] ss:$8 sps:$4 sm:$0xff]   ;;  %v1497_v34 = vld [vmem:[#allocation5 + $0x10] sm:$0xff]   ;;  %v1507_v0 = vld [vmem:[#allocation5 + $0x38] sm:$0xff]  }
  0x46   :  { %731 = vmatprep.subr.bf16.mxu0 %v1369_v19  ;;  %687 = vmatpush1.bf16.msra.mxu1 %v1440_v42  ;;  %v1427_v19 = vld [vmem:[#allocation2 + $0x264] ss:$8 sps:$4 sm:$0xff]   ;;  %v1501_v42 = vld [vmem:[#allocation5 + $0x20] sm:$0xff]  }
  0x47   :  { %688 = vmatprep.subr.bf16.mxu1 %v1441_v43  ;;  %v1455_v43 = vld [vmem:[#allocation2 + $0x2b0] ss:$8 sps:$4 sm:$0xff]   ;;  %v1487_v53 = vld [vmem:[#allocation2 + $0x304] ss:$8 sps:$4 sm:$0xff]  }
  0x49   :  { %732 = vmatpush1.bf16.msra.mxu0 %v1371_v24  ;;  %v1433_v24 = vld [vmem:[#allocation2 + $0x274] ss:$8 sps:$4 sm:$0xff]  }
  0x4a   :  { %733 = vmatprep.subr.bf16.mxu0 %v1372_v25  ;;  %689 = vmatpush1.bf16.msra.mxu1 %v1446_v46  ;;  %v63_v25 = vpack.c.bf16 %v56_v21, %v56_v21  ;;  %v1469_v46 = vld [vmem:[#allocation2 + $0x2d4] ss:$8 sps:$4 sm:$0xff]  }
  0x4b   :  { %690 = vmatprep.subr.bf16.mxu1 %v1447_v47  ;;  %v1467_v47 = vld [vmem:[#allocation2 + $0x2d0] ss:$8 sps:$4 sm:$0xff]  }
  0x4d   :  { %734 = vmatpush1.bf16.msra.mxu0 %v1374_v28  ;;  %v1431_v28 = vld [vmem:[#allocation2 + $0x270] ss:$8 sps:$4 sm:$0xff]  }
  0x4e   :  { %735 = vmatprep.subr.bf16.mxu0 %v1375_v29  ;;  %691 = vmatpush1.bf16.msra.mxu1 %v1452_v50  ;;  %v1439_v29 = vld [vmem:[#allocation2 + $0x284] ss:$8 sps:$4 sm:$0xff]   ;;  %v1481_v50 = vld [vmem:[#allocation2 + $0x2f4] ss:$8 sps:$4 sm:$0xff]  }
  0x4f   :  { %692 = vmatprep.subr.bf16.mxu1 %v1453_v52  ;;  %v60_v52 = vld [vmem:[%s1730_s0 + $0x20] sm:$0xff] }
  0x51   :  { %736 = vmatpush1.bf16.msra.mxu0 %v1377_v32  ;;  %v1437_v32 = vld [vmem:[#allocation2 + $0x280] ss:$8 sps:$4 sm:$0xff]  }
  0x52   :  { %737 = vmatprep.subr.bf16.mxu0 %v1378_v33  ;;  %693 = vmatpush1.bf16.msra.mxu1 %v1458_v55  ;;  %v1445_v33 = vld [vmem:[#allocation2 + $0x294] ss:$8 sps:$4 sm:$0xff]   ;;  %v1485_v55 = vld [vmem:[#allocation2 + $0x300] ss:$8 sps:$4 sm:$0xff]  }
  0x53   :  { %694 = vmatprep.subr.bf16.mxu1 %v1459_v56  ;;  %v1594_v56 = vmov 0  }
  0x55   :  { %738 = vmatpush1.bf16.msra.mxu0 %v1380_v36  ;;  %v1443_v36 = vld [vmem:[#allocation2 + $0x290] ss:$8 sps:$4 sm:$0xff]  }
  0x56   :  { %739 = vmatprep.subr.bf16.mxu0 %v1381_v37  ;;  %695 = vmatpush1.bf16.msra.mxu1 %v1464_v62  ;;  %v1451_v37 = vld [vmem:[#allocation2 + $0x2a4] ss:$8 sps:$4 sm:$0xff]  }
  0x57   :  { %696 = vmatprep.subr.bf16.mxu1 %v1465_v63  ;;  %v1505_v62 = vld [vmem:[#allocation5 + $0x30] sm:$0xff]   ;;  %v1506_v63 = vld [vmem:[#allocation5 + $0x78] sm:$0xff]  }
  0x59   :  { %740 = vmatpush1.bf16.msra.mxu0 %v1383_v40  ;;  %v1449_v40 = vld [vmem:[#allocation2 + $0x2a0] ss:$8 sps:$4 sm:$0xff]  }
  0x5a   :  { %741 = vmatprep.subr.bf16.mxu0 %v1384_v41  ;;  %697 = vmatpush1.bf16.msra.mxu1 %v1470_v4  ;;  %v1457_v41 = vld [vmem:[#allocation2 + $0x2b4] ss:$8 sps:$4 sm:$0xff]  }
  0x5b   :  { %698 = vmatprep.subr.bf16.mxu1 %v1471_v5 }
  0x5d   :  { %742 = vmatpush1.bf16.msra.mxu0 %v1386_v44  ;;  %v1463_v44 = vld [vmem:[#allocation2 + $0x2c4] ss:$8 sps:$4 sm:$0xff]  }
  0x5e   :  { %743 = vmatprep.subr.bf16.mxu0 %v1387_v45  ;;  %699 = vmatpush1.bf16.msra.mxu1 %v1476_v8  ;;  %v1461_v45 = vld [vmem:[#allocation2 + $0x2c0] ss:$8 sps:$4 sm:$0xff]  }
  0x5f   :  { %700 = vmatprep.subr.bf16.mxu1 %v1477_v9  ;;  %v168_v9 = vld [vmem:[%s1732_s2] sm:$0x3] }
  0x61   :  { %744 = vmatpush1.bf16.msra.mxu0 %v1389_v48  ;;  %v1475_v48 = vld [vmem:[#allocation2 + $0x2e4] ss:$8 sps:$4 sm:$0xff]  }
  0x62   :  { %745 = vmatprep.subr.bf16.mxu0 %v1390_v49  ;;  %701 = vmatpush1.bf16.msra.mxu1 %v1482_v13  ;;  %v1473_v49 = vld [vmem:[#allocation2 + $0x2e0] ss:$8 sps:$4 sm:$0xff]  }
  0x63   :  { %702 = vmatprep.subr.bf16.mxu1 %v1483_v14 }
  0x65   :  { %746 = vmatpush1.bf16.msra.mxu0 %v1392_v51  ;;  %v1479_v51 = vld [vmem:[#allocation2 + $0x2f0] ss:$8 sps:$4 sm:$0xff]  }
  0x66   :  { %756 = vmatprep.subr.bf16.mxu0 %v1395_v54  ;;  %703 = vmatpush1.bf16.msra.mxu1 %v1488_v16  ;;  %v67_v54 = vpack.c.bf16 %v60_v52, %v60_v52 }
  0x67   :  { %704 = vmatprep.subr.bf16.mxu1 %v1489_v17 }
  0x68   :  { %748 = vmatmul.mubr.bf16.vlgmr.msra.gmra.mrb[0].mxu0 %v65_v57  ;;  %v62_v57 = vld [vmem:[%s1730_s0 + $0x30] sm:$0xff] }
  0x69   :  { %757 = vmatpush1.bf16.msra.mxu0 %v1393_v59  ;;  %788 = vmatprep.mubr.bf16.mxu0 %v68_v60  ;;  %v69_v58 = vpack.c.bf16 %v62_v57, %v62_v57  ;;  %v1502_v59 = vld [vmem:[#allocation5 + $0x68] sm:$0xff]  }
  0x6a   :  { %758 = vmatprep.subr.bf16.mxu0 %v1398_v61  ;;  %705 = vmatpush1.bf16.msra.mxu1 %v1491_v20  ;;  %v1503_v60 = vld [vmem:[#allocation5 + $0x28] sm:$0xff]   ;;  %v1504_v61 = vld [vmem:[#allocation5 + $0x70] sm:$0xff]  }
  0x6b   :  { %1272 = vmatprep.subr.bf16.mxu1 %v1492_v22 }
  0x6d   :  { %759 = vmatpush1.bf16.msra.mxu0 %v1396_v1  ;;  %707 = vmatmul.mubr.bf16.vlgmr.msra.gmra.mrb[0].mxu1 %v63_v25  ;;  %v1595_v1 = vmov 0.0  }
  0x6e   :  { %760 = vmatprep.subr.bf16.mxu0 %v1403_v3  ;;  %1273 = vmatpush3.bf16.msra.mxu1 %v1493_v26  ;;  %v1509_v26 = vld [vmem:[%s1735_s5 + $0x8] sm:$0xff]  }
  0x6f   :  { %1274 = vmatprep.subr.bf16.mxu1 %v1494_v27  ;;  %v1510_v27 = vld [vmem:[%s1735_s5 + $0x10] sm:$0xff]  }
  0x71   :  { %761 = vmatpush1.bf16.msra.mxu0 %v1401_v6  ;;  %v170_v6 = vlaneseq }
  0x72   :  { %762 = vmatprep.subr.bf16.mxu0 %v1409_v7  ;;  %1275 = vmatpush3.bf16.msra.mxu1 %v1495_v30  ;;  %v1513_v30 = vld [vmem:[%s1735_s5 + $0x28] sm:$0xff]  }
  0x73   :  { %1276 = vmatprep.subr.bf16.mxu1 %v1496_v31  ;;  %v171_v7 = vshrl.u32 %v170_v6, 7  ;;  %v1514_v31 = vld [vmem:[%s1735_s5 + $0x30] sm:$0xff]  }
  0x75   :  { %763 = vmatpush1.bf16.msra.mxu0 %v1407_v10  ;;  %v172_v8 = vsub.s32 0, %v171_v7  ;;  %v176_v10 = vsub.s32 1, %v171_v7 }
  0x76   :  { %764 = vmatprep.subr.bf16.mxu0 %v1415_v11  ;;  %1277 = vmatpush3.bf16.msra.mxu1 %v1497_v34  ;;  %v1246_v34 = vld [vmem:[%s1734_s4] ss:$0 sm:$0xff] }
  0x77   :  { %1278 = vmatprep.subr.bf16.mxu1 %v1498_v35  ;;  %v173_v11 = vrot.slane %v168_v9, %v172_v8 }
  0x79   :  { %765 = vmatpush1.bf16.msra.mxu0 %v1413_v12  ;;  %v177_v12 = vrot.slane %v168_v9, %v176_v10 }
  0x7a   :  { %766 = vmatprep.subr.bf16.mxu0 %v1421_v15  ;;  %1279 = vmatpush3.bf16.msra.mxu1 %v1499_v38 }
  0x7b   :  { %1280 = vmatprep.subr.bf16.mxu1 %v1500_v39 }
  0x7d   :  { %767 = vmatpush1.bf16.msra.mxu0 %v1419_v18 }
  0x7e   :  { %768 = vmatprep.subr.bf16.mxu0 %v1427_v19  ;;  %1281 = vmatpush3.bf16.msra.mxu1 %v1501_v42  ;;  %v1263_v42 = vld [vmem:[%s1736_s6] ss:$0 sm:$0xff] }
  0x7f   :  { %1282 = vmatprep.subr.bf16.mxu1 %v1502_v59 }
  0x81   :  { %769 = vmatpush1.bf16.msra.mxu0 %v1425_v23 }
  0x82   :  { %770 = vmatprep.subr.bf16.mxu0 %v1433_v24  ;;  %1283 = vmatpush3.bf16.msra.mxu1 %v1503_v60  ;;  %v1508_v24 = vld [vmem:[%s1735_s5] sm:$0xff]  }
  0x83   :  { %1284 = vmatprep.subr.bf16.mxu1 %v1504_v61 }
  0x85   :  { %771 = vmatpush1.bf16.msra.mxu0 %v1431_v28  ;;  %v1511_v28 = vld [vmem:[%s1735_s5 + $0x18] sm:$0xff]  }
  0x86   :  { %772 = vmatprep.subr.bf16.mxu0 %v1439_v29  ;;  %1285 = vmatpush3.bf16.msra.mxu1 %v1505_v62  ;;  %v1512_v29 = vld [vmem:[%s1735_s5 + $0x20] sm:$0xff]  }
  0x87   :  { %1286 = vmatprep.subr.bf16.mxu1 %v1506_v63 }
  0x89   :  { %773 = vmatpush1.bf16.msra.mxu0 %v1437_v32  ;;  %v1515_v32 = vld [vmem:[%s1735_s5 + $0x38] sm:$0xff]   ;;  %s1597_s5 = smov [#allocation7]  }
  0x8a   :  { %774 = vmatprep.subr.bf16.mxu0 %v1445_v33  ;;  %1287 = vmatpush3.bf16.msra.mxu1 %v1507_v0  ;;  %s1137_s13 = sshll.u32 %s1597_s5, 4  ;;  %s1138_s13 = int_to_ptr.vmem [resolvable:$true] %s1137_s13 }
  0x8b   :  { %1303 = vmatprep.subr.bf16.mxu1 %v1595_v1  ;;  %s1560_s4 = scalar_lea.vmem %s1138_s13, 128  ;;  %p1565_p3 = scmp.lt.s32.totalorder %s1138_s13, %s1138_s13 }
  0x8c   :  { %p1561_p2 = scmp.ne.s32.totalorder %s1138_s13, %s1560_s4  ;;  %p1566_p4 = scmp.lt.s32.totalorder %s1560_s4, %s1560_s4 }
  0x8d   :  { %775 = vmatpush1.bf16.msra.mxu0 %v1443_v36 }
  0x8e   :  { %776 = vmatprep.subr.bf16.mxu0 %v1451_v37  ;;  %p1567_p5 = por %p1566_p4, %p1565_p3 }
  0x90   :  { %p1568_p6 = pnand %p1567_p5, %p1561_p2 }
  0x91   :  { %777 = vmatpush1.bf16.msra.mxu0 %v1449_v40 }
  0x92   :  { %778 = vmatprep.subr.bf16.mxu0 %v1457_v41 }
  0x95   :  { %779 = vmatpush1.bf16.msra.mxu0 %v1455_v43 }
  0x96   :  { %780 = vmatprep.subr.bf16.mxu0 %v1463_v44 }
  0x99   :  { %781 = vmatpush1.bf16.msra.mxu0 %v1461_v45 }
  0x9a   :  { %782 = vmatprep.subr.bf16.mxu0 %v1469_v46 }
  0x9d   :  { %783 = vmatpush1.bf16.msra.mxu0 %v1467_v47 }
  0x9e   :  { %784 = vmatprep.subr.bf16.mxu0 %v1475_v48 }
  0xa1   :  { %785 = vmatpush1.bf16.msra.mxu0 %v1473_v49 }
  0xa2   :  { %786 = vmatprep.subr.bf16.mxu0 %v1481_v50 }
  0xa5   :  { %787 = vmatpush1.bf16.msra.mxu0 %v1479_v51 }
  0xa6   :  { %797 = vmatprep.subr.bf16.mxu0 %v1487_v53 }
  0xa8   :  { %789 = vmatmul.mubr.bf16.vlgmr.msra.gmra.mrb[0].mxu0 %v67_v54 }
  0xa9   :  { %798 = vmatpush1.bf16.msra.mxu0 %v1485_v55  ;;  %829 = vmatprep.mubr.bf16.mxu0 %v1594_v56 }
  0xb4   :  { %1245 = vmatmul.mubr.msk.bf16.vlgmr.msra.gmra.mrb[0].mxu0 %vm670_vm0, %v69_v58 }
 0x140   :  { %v708_v2 = vpop.f32.mrb[0].mxu1 }
 0x141   :  { %v710_v3 = vpop.f32.mrb[1].mxu1  ;;  %v709_v13 = vadd.f32 %v708_v2, %v173_v11 }
 0x142   :  { %v712_v4 = vpop.f32.mrb[2].mxu1  ;;  %v711_v14 = vadd.f32 %v710_v3, %v177_v12 }
 0x143   :  { %v713_v5 = vpop.f32.mrb[3].mxu1 }
 0x187   :  { %v831_v15 = vpop.f32.mrb[0].mxu0 }
 0x188   :  { %v1324_v16 = vadd.f32 %v831_v15, %v709_v13  ;;  %v833_v17 = vpop.f32.mrb[1].mxu0 }
 0x189   :  { %v1326_v18 = vadd.f32 %v833_v17, %v711_v14  ;;  %v835_v19 = vpop.f32.mrb[2].mxu0 }
 0x18a   :  { %v838_v20 = vmax.f32 %v1324_v16, 0.0  ;;  %v836_v21 = vpop.f32.mrb[3].mxu0 }
 0x18b   :  { %v839_v22 = vmax.f32 %v1326_v18, 0.0 }
 0x18c   :  { %v840_v25 = vpack.c.bf16 %v838_v20, %v838_v20 }
 0x18d   :  { %v841_v23 = vpack.c.bf16 %v839_v22, %v839_v22 }
 0x18f   :  { %1009 = vmatprep.mubr.bf16.mxu1 %v841_v23 }
 0x190   :  { %1010 = vmatmul.mubr.bf16.vlgmr.msra.gmra.mrb[4].mxu1 %v840_v25 }
 0x191   :  { %1304 = vmatpush3.bf16.msra.mxu1 %v1508_v24  ;;  %1319 = vmatprep.mubr.msk.bf16.mxu1 %vm1596_vm1, %v1595_v1 }
 0x192   :  { %1305 = vmatprep.subr.bf16.mxu1 %v1595_v1 }
 0x195   :  { %1306 = vmatpush3.bf16.msra.mxu1 %v1509_v26 }
 0x196   :  { %1307 = vmatprep.subr.bf16.mxu1 %v1595_v1 }
 0x199   :  { %1308 = vmatpush3.bf16.msra.mxu1 %v1510_v27 }
 0x19a   :  { %1309 = vmatprep.subr.bf16.mxu1 %v1595_v1 }
 0x19d   :  { %1310 = vmatpush3.bf16.msra.mxu1 %v1511_v28 }
 0x19e   :  { %1311 = vmatprep.subr.bf16.mxu1 %v1595_v1 }
 0x1a1   :  { %1312 = vmatpush3.bf16.msra.mxu1 %v1512_v29 }
 0x1a2   :  { %1313 = vmatprep.subr.bf16.mxu1 %v1595_v1 }
 0x1a5   :  { %1314 = vmatpush3.bf16.msra.mxu1 %v1513_v30 }
 0x1a6   :  { %1315 = vmatprep.subr.bf16.mxu1 %v1595_v1 }
 0x1a9   :  { %1316 = vmatpush3.bf16.msra.mxu1 %v1514_v31 }
 0x1aa   :  { %1317 = vmatprep.subr.bf16.mxu1 %v1595_v1 }
 0x1ad   :  { %1318 = vmatpush3.bf16.msra.mxu1 %v1515_v32 }
 0x263   :  { %v1288_v33 = vpop.f32.mrb[4].mxu1 }
 0x264   :  { %v1289_v35 = vpop.f32.mrb[5].mxu1 }
 0x265   :  { %v1290_v36 = vadd.f32 %v1289_v35, %v1288_v33  ;;  %v1291_v37 = vpop.f32.mrb[6].mxu1 }
 0x266   :  { %v1292_v38 = vpop.f32.mrb[7].mxu1 }
 0x267   :  { %v1012_v39 = vadd.f32 %v1290_v36, %v1246_v34 }
 0x269   :  { %v1017_v40 = vmax.f32 %v1012_v39, 0.0 }
 0x26b   :  { %v1018_v41 = vpack.c.bf16 %v1017_v40, %v1017_v40 }
 0x26d   :  { %1320 = vmatmul.mubr.bf16.vlgmr.msra.gmra.mrb[8].mxu1 %v1018_v41 }
 0x340   :  { %v1124_v43 = vpop.f32.mrb[8].mxu1 }
 0x341   :  { %v1125_v44 = vadd.f32 %v1263_v42, %v1124_v43  ;;  %v1321_v45 = vpop.f32.mrb[9].mxu1 }
 0x342   :  { %v1127_v46 = vpop.f32.mrb[10].mxu1 }
 0x343   :  { %1130 = vst.msk [vmem:[#allocation7] sm:$0xff] %vm670_vm0, %v1125_v44  ;;  %v1322_v47 = vpop.f32.mrb[11].mxu1 }
 0x344   :  { %1571 = shalt.err (!%p1568_p6)
}
 0x345   :  { %s1572_s6 = scalar_lea.hbm %s1737_s7, 128 }
 0x346   :  { %p1573_p7 = scmp.ne.s32.totalorder %s1737_s7, %s1572_s6  ;;  %p1576_p8 = scmp.lt.u32.totalorder %s1572_s6, %s1737_s7 }
 0x348   :  { %p1578_p9 = pnand %p1576_p8, %p1573_p7 }
 0x34a   :  { %1581 = shalt.err (!%p1578_p9)
}
 0x34b   :  { %1140 = dma.vmem_to_hbm [thread:$0]  %s1138_s13, 128, %s1737_s7, [#allocation4]  }
 0x34c   :  { %1586 = dma.done.wait [#allocation4], 128  }
 0x34d   :  { %1587 = vsyncadd [#allocation4], 4294967168 }
 0x34e   :  { %1144 = vsyncpa [#allocation3], 1 }
 0x34f   :  { %1145 = vsyncpa [#allocation6], 1 }
 0x350   :  { %1146 = vsyncpa [#allocation4], 1 }

</bundles_post_ra>
